<compile_context>
chip_gen: v5e
topology: v5e:2x2
jax: 0.10.0
libtpu: 0.0.40
codegen_flags: <defaults>
</compile_context>

<pallas_src>
import jax
import jax.numpy as jnp
from jax.experimental import pallas as pl
from jax.experimental.pallas import tpu as pltpu

# Logical dims of the PyTorch module.
IN_DIM, H1_DIM, H2_DIM, OUT_DIM = 50, 100, 50, 1
# Padded, (8,128)-friendly dims.
IN_P, H1_P, H2_P, OUT_P = 64, 128, 64, 128


def mlp_kernel(x_ref, w1_ref, b1_ref, w2_ref, b2_ref, w3_ref, b3_ref, o_ref):
    # fc1 + ReLU : bf16 x bf16 -> f32 accumulate on the MXU, elementwise in f32.
    h1 = jnp.dot(x_ref[...], w1_ref[...], preferred_element_type=jnp.float32) + b1_ref[...]
    h1 = jnp.maximum(h1, 0.0)
    # fc2 + ReLU
    h2 = jnp.dot(h1.astype(jnp.bfloat16), w2_ref[...],
                 preferred_element_type=jnp.float32) + b2_ref[...]
    h2 = jnp.maximum(h2, 0.0)
    # fc3 + sigmoid (lane-dense 128-wide output block; only column 0 is meaningful)
    z = jnp.dot(h2.astype(jnp.bfloat16), w3_ref[...],
                preferred_element_type=jnp.float32) + b3_ref[...]
    o_ref[...] = jax.nn.sigmoid(z)


def _pad_to(a, shape):
    return jnp.pad(a, [(0, t - s) for s, t in zip(a.shape, shape)])


def simple_nn_forward(x, params, *, tile_b=512):
    """x: (B, 50) float32. params: w1,b1,w2,b2,w3,b3 with weights stored (in, out)."""
    B = x.shape[0]

    # ---- pad & cast once in the wrapper (HBM side) ----
    b8 = ((B + 7) // 8) * 8                       # batch multiple of 8 (sublane)
    tile_b = min(tile_b, b8)
    b_pad = ((b8 + tile_b - 1) // tile_b) * tile_b  # multiple of the batch tile

    x_p = _pad_to(x, (b_pad, IN_P)).astype(jnp.bfloat16)
    w1 = _pad_to(params["w1"], (IN_P, H1_P)).astype(jnp.bfloat16)
    w2 = _pad_to(params["w2"], (H1_P, H2_P)).astype(jnp.bfloat16)
    w3 = _pad_to(params["w3"], (H2_P, OUT_P)).astype(jnp.bfloat16)
    b1 = _pad_to(params["b1"], (1, H1_P)).astype(jnp.float32)
    b2 = _pad_to(params["b2"], (1, H2_P)).astype(jnp.float32)
    b3 = _pad_to(params["b3"], (1, OUT_P)).astype(jnp.float32)

    grid = (b_pad // tile_b,)
    # Weights / biases: constant index_map -> stay resident in VMEM across the batch grid.
    resident = lambda shape: pl.BlockSpec(shape, lambda i: (0, 0))

    out_p = pl.pallas_call(
        mlp_kernel,
        out_shape=jax.ShapeDtypeStruct((b_pad, OUT_P), jnp.float32),
        grid=grid,
        in_specs=[
            pl.BlockSpec((tile_b, IN_P), lambda i: (i, 0)),   # streamed x tiles (pipelined)
            resident(w1.shape), resident(b1.shape),
            resident(w2.shape), resident(b2.shape),
            resident(w3.shape), resident(b3.shape),
        ],
        out_specs=pl.BlockSpec((tile_b, OUT_P), lambda i: (i, 0)),
        compiler_params=pltpu.CompilerParams(
            dimension_semantics=("parallel",),                # megacore sharding on v7x
        ),
    )(x_p, w1, b1, w2, b2, w3, b3)

    # Strip batch padding and the padded output lanes (sigmoid(0)=0.5 in padded lanes).
    return out_p[:B, :OUT_DIM]


def init_params(key):
    """Deterministic init mimicking PyTorch nn.Linear's U(-1/sqrt(fan_in), 1/sqrt(fan_in))."""
    dims = [(IN_DIM, H1_DIM), (H1_DIM, H2_DIM), (H2_DIM, OUT_DIM)]
    params = {}
    for i, (fan_in, fan_out) in enumerate(dims, start=1):
        key, kw, kb = jax.random.split(key, 3)
        bound = 1.0 / (fan_in ** 0.5)
        # stored (in, out): equals PyTorch weight (out, in) transposed
        params[f"w{i}"] = jax.random.uniform(kw, (fan_in, fan_out), jnp.float32, -bound, bound)
        params[f"b{i}"] = jax.random.uniform(kb, (1, fan_out), jnp.float32, -bound, bound)
    return params


def reference_forward_f32(x, params):
    """Exact semantics of the PyTorch module, full f32."""
    h1 = jnp.maximum(x @ params["w1"] + params["b1"], 0.0)
    h2 = jnp.maximum(h1 @ params["w2"] + params["b2"], 0.0)
    return jax.nn.sigmoid(h2 @ params["w3"] + params["b3"])


def reference_forward_bf16(x, params):
    """Pure-JAX reference that mirrors the kernel's bf16-input / f32-accumulate math."""
    bf = jnp.bfloat16
    h1 = jnp.maximum(
        jnp.dot(x.astype(bf), params["w1"].astype(bf),
                preferred_element_type=jnp.float32) + params["b1"], 0.0)
    h2 = jnp.maximum(
        jnp.dot(h1.astype(bf), params["w2"].astype(bf),
                preferred_element_type=jnp.float32) + params["b2"], 0.0)
    z = jnp.dot(h2.astype(bf), params["w3"].astype(bf),
                preferred_element_type=jnp.float32) + params["b3"]
    return jax.nn.sigmoid(z)


if __name__ == "__main__":
    key = jax.random.PRNGKey(0)
    key, kx = jax.random.split(key)
    B = 8
    x = jax.random.normal(kx, (B, IN_DIM), jnp.float32)
    params = init_params(key)

    out = simple_nn_forward(x, params)
    out = jax.block_until_ready(out)
    assert out.shape == (B, OUT_DIM), out.shape

    # Tight check vs a reference that uses the same bf16-input math.
    ref_bf16 = reference_forward_bf16(x, params)
    assert jnp.allclose(out, ref_bf16, atol=1e-2, rtol=1e-2), "mismatch vs bf16-math reference"

    # Loose check vs the full-f32 PyTorch-equivalent forward (bf16 quantization error only).
    ref_f32 = reference_forward_f32(x, params)
    assert jnp.allclose(out, ref_f32, atol=3e-2, rtol=3e-2), "mismatch vs f32 module reference"

    print("KERNEL_OK")
</pallas_src>

<mosaic_0001>
module attributes {stable_mosaic.version = 11 : i64} {
  func.func @mlp_kernel(%arg0: i32, %arg1: memref<8x64xbf16, #tpu.memory_space<vmem>>, %arg2: memref<64x128xbf16, #tpu.memory_space<vmem>>, %arg3: memref<1x128xf32, #tpu.memory_space<vmem>>, %arg4: memref<128x64xbf16, #tpu.memory_space<vmem>>, %arg5: memref<1x64xf32, #tpu.memory_space<vmem>>, %arg6: memref<64x128xbf16, #tpu.memory_space<vmem>>, %arg7: memref<1x128xf32, #tpu.memory_space<vmem>>, %arg8: memref<8x128xf32, #tpu.memory_space<vmem>>) attributes {dimension_semantics = [#tpu.dimension_semantics<parallel>], iteration_bounds = array<i64: 1>, scalar_prefetch = 0 : i64, scratch_operands = 0 : i64, tpu.core_type = #tpu.core_type<tc>, window_params = [{transform_indices = @transform_0, window_bounds = array<i64: 8, 64>}, {pipeline_mode = #tpu.pipeline_mode<synchronous>, transform_indices = @transform_1, window_bounds = array<i64: 64, 128>}, {pipeline_mode = #tpu.pipeline_mode<synchronous>, transform_indices = @transform_2, window_bounds = array<i64: 1, 128>}, {pipeline_mode = #tpu.pipeline_mode<synchronous>, transform_indices = @transform_3, window_bounds = array<i64: 128, 64>}, {pipeline_mode = #tpu.pipeline_mode<synchronous>, transform_indices = @transform_4, window_bounds = array<i64: 1, 64>}, {pipeline_mode = #tpu.pipeline_mode<synchronous>, transform_indices = @transform_5, window_bounds = array<i64: 64, 128>}, {pipeline_mode = #tpu.pipeline_mode<synchronous>, transform_indices = @transform_6, window_bounds = array<i64: 1, 128>}, {transform_indices = @transform_7, window_bounds = array<i64: 8, 128>}]} {
    %c0 = arith.constant 0 : index
    %c0_0 = arith.constant 0 : index
    %0 = vector.load %arg1[%c0, %c0_0] : memref<8x64xbf16, #tpu.memory_space<vmem>>, vector<8x64xbf16>
    %c0_1 = arith.constant 0 : index
    %c0_2 = arith.constant 0 : index
    %1 = vector.load %arg2[%c0_1, %c0_2] : memref<64x128xbf16, #tpu.memory_space<vmem>>, vector<64x128xbf16>
    %cst = arith.constant dense<0.000000e+00> : vector<8x128xf32>
    %2 = tpu.matmul %0, %1, %cst {dimension_numbers = #tpu.dot_dimension_numbers<[1], [0], [0], [1], [0, 0, 1, 1], [], []>} : vector<8x64xbf16>, vector<64x128xbf16>, vector<8x128xf32> -> vector<8x128xf32>
    %c0_3 = arith.constant 0 : index
    %c0_4 = arith.constant 0 : index
    %3 = vector.load %arg3[%c0_3, %c0_4] : memref<1x128xf32, #tpu.memory_space<vmem>>, vector<1x128xf32>
    %4 = vector.broadcast %3 : vector<1x128xf32> to vector<8x128xf32>
    %5 = arith.addf %2, %4 : vector<8x128xf32>
    %cst_5 = arith.constant 0.000000e+00 : f32
    %6 = vector.broadcast %cst_5 : f32 to vector<8x128xf32>
    %7 = arith.maximumf %5, %6 : vector<8x128xf32>
    %8 = arith.truncf %7 : vector<8x128xf32> to vector<8x128xbf16>
    %c0_6 = arith.constant 0 : index
    %c0_7 = arith.constant 0 : index
    %9 = vector.load %arg4[%c0_6, %c0_7] : memref<128x64xbf16, #tpu.memory_space<vmem>>, vector<128x64xbf16>
    %cst_8 = arith.constant dense<0.000000e+00> : vector<8x64xf32>
    %10 = tpu.matmul %8, %9, %cst_8 {dimension_numbers = #tpu.dot_dimension_numbers<[1], [0], [0], [1], [0, 0, 1, 1], [], []>} : vector<8x128xbf16>, vector<128x64xbf16>, vector<8x64xf32> -> vector<8x64xf32>
    %c0_9 = arith.constant 0 : index
    %c0_10 = arith.constant 0 : index
    %11 = vector.load %arg5[%c0_9, %c0_10] : memref<1x64xf32, #tpu.memory_space<vmem>>, vector<1x64xf32>
    %12 = vector.broadcast %11 : vector<1x64xf32> to vector<8x64xf32>
    %13 = arith.addf %10, %12 : vector<8x64xf32>
    %cst_11 = arith.constant 0.000000e+00 : f32
    %14 = vector.broadcast %cst_11 : f32 to vector<8x64xf32>
    %15 = arith.maximumf %13, %14 : vector<8x64xf32>
    %16 = arith.truncf %15 : vector<8x64xf32> to vector<8x64xbf16>
    %c0_12 = arith.constant 0 : index
    %c0_13 = arith.constant 0 : index
    %17 = vector.load %arg6[%c0_12, %c0_13] : memref<64x128xbf16, #tpu.memory_space<vmem>>, vector<64x128xbf16>
    %cst_14 = arith.constant dense<0.000000e+00> : vector<8x128xf32>
    %18 = tpu.matmul %16, %17, %cst_14 {dimension_numbers = #tpu.dot_dimension_numbers<[1], [0], [0], [1], [0, 0, 1, 1], [], []>} : vector<8x64xbf16>, vector<64x128xbf16>, vector<8x128xf32> -> vector<8x128xf32>
    %c0_15 = arith.constant 0 : index
    %c0_16 = arith.constant 0 : index
    %19 = vector.load %arg7[%c0_15, %c0_16] : memref<1x128xf32, #tpu.memory_space<vmem>>, vector<1x128xf32>
    %20 = vector.broadcast %19 : vector<1x128xf32> to vector<8x128xf32>
    %21 = arith.addf %18, %20 : vector<8x128xf32>
    %22 = arith.negf %21 : vector<8x128xf32>
    %23 = math.exp %22 : vector<8x128xf32>
    %cst_17 = arith.constant 1.000000e+00 : f32
    %24 = vector.broadcast %cst_17 : f32 to vector<8x128xf32>
    %25 = arith.addf %24, %23 : vector<8x128xf32>
    %26 = arith.divf %24, %25 : vector<8x128xf32>
    %c0_18 = arith.constant 0 : index
    %c0_19 = arith.constant 0 : index
    %27 = vector.load %arg8[%c0_18, %c0_19] : memref<8x128xf32, #tpu.memory_space<vmem>>, vector<8x128xf32>
    tpu.vector_store %arg8[%c0_18, %c0_19], %26 {strides = array<i32>} : memref<8x128xf32, #tpu.memory_space<vmem>>, vector<8x128xf32>,
    return
  }
  func.func @transform_0(%arg0: i32) -> (i32, i32) {
    %c0_i32 = arith.constant 0 : i32
    %c0_i32_0 = arith.constant 0 : i32
    return %arg0, %c0_i32 : i32, i32
  }
  func.func @transform_1(%arg0: i32) -> (i32, i32) {
    %c0_i32 = arith.constant 0 : i32
    %c0_i32_0 = arith.constant 0 : i32
    %c0_i32_1 = arith.constant 0 : i32
    return %c0_i32, %c0_i32_0 : i32, i32
  }
  func.func @transform_2(%arg0: i32) -> (i32, i32) {
    %c0_i32 = arith.constant 0 : i32
    %c0_i32_0 = arith.constant 0 : i32
    %c0_i32_1 = arith.constant 0 : i32
    return %c0_i32, %c0_i32_0 : i32, i32
  }
  func.func @transform_3(%arg0: i32) -> (i32, i32) {
    %c0_i32 = arith.constant 0 : i32
    %c0_i32_0 = arith.constant 0 : i32
    %c0_i32_1 = arith.constant 0 : i32
    return %c0_i32, %c0_i32_0 : i32, i32
  }
  func.func @transform_4(%arg0: i32) -> (i32, i32) {
    %c0_i32 = arith.constant 0 : i32
    %c0_i32_0 = arith.constant 0 : i32
    %c0_i32_1 = arith.constant 0 : i32
    return %c0_i32, %c0_i32_0 : i32, i32
  }
  func.func @transform_5(%arg0: i32) -> (i32, i32) {
    %c0_i32 = arith.constant 0 : i32
    %c0_i32_0 = arith.constant 0 : i32
    %c0_i32_1 = arith.constant 0 : i32
    return %c0_i32, %c0_i32_0 : i32, i32
  }
  func.func @transform_6(%arg0: i32) -> (i32, i32) {
    %c0_i32 = arith.constant 0 : i32
    %c0_i32_0 = arith.constant 0 : i32
    %c0_i32_1 = arith.constant 0 : i32
    return %c0_i32, %c0_i32_0 : i32, i32
  }
  func.func @transform_7(%arg0: i32) -> (i32, i32) {
    %c0_i32 = arith.constant 0 : i32
    %c0_i32_0 = arith.constant 0 : i32
    return %arg0, %c0_i32 : i32, i32
  }
}

</mosaic_0001>

<bundles_post_ra>
// kernel: tpu_custom_call.1
= control target key start
LH: loop header
LB: loop body
LE: loop exit
PB: predicated region body
PF: predicated region fallthrough
CT: control target
= control target key end

     0   :  { %s478_s0 = inlined_call_operand.vmem [shape: bf16[8,64], index: 0, kind: input, shape index: {}]   ;;  %s479_s1 = inlined_call_operand.vmem [shape: bf16[64,128], index: 1, kind: input, shape index: {}]   ;;  %s480_s2 = inlined_call_operand.vmem [shape: f32[1,128], index: 2, kind: input, shape index: {}]   ;;  %s481_s3 = inlined_call_operand.vmem [shape: bf16[128,64], index: 3, kind: input, shape index: {}]   ;;  %s482_s4 = inlined_call_operand.vmem [shape: f32[1,64], index: 4, kind: input, shape index: {}]   ;;  %s483_s5 = inlined_call_operand.vmem [shape: bf16[64,128], index: 5, kind: input, shape index: {}]   ;;  %s484_s6 = inlined_call_operand.vmem [shape: f32[1,128], index: 6, kind: input, shape index: {}]   ;;  %s485_s7 = inlined_call_operand.hbm [shape: f32[8,128], index: 7, kind: output, shape index: {}]  }
   0x1   :  { %v325_v0 = vld [vmem:[%s479_s1 + $0x18] sm:$0xff]  ;;  %v324_v2 = vld [vmem:[%s479_s1 + $0x10] sm:$0xff] }
   0x2   :  { %v333_v1 = vld [vmem:[%s481_s3 + $0x38] sm:$0xff]  ;;  %73 = vmatpush.bf16.msra.mxu0 %v325_v0  ;;  %v332_v3 = vld [vmem:[%s481_s3 + $0x30] sm:$0xff] }
   0x3   :  { %152 = vmatpush.bf16.msra.mxu1 %v333_v1 }
   0x4   :  { %12 = vsyncpa [#allocation3], 0  ;;  %v323_v4 = vld [vmem:[%s479_s1 + $0x8] sm:$0xff]  ;;  %v322_v6 = vld [vmem:[%s479_s1] sm:$0xff]  ;;  %vm65_vm0 = vcmask 523264  }
   0x5   :  { %v331_v5 = vld [vmem:[%s481_s3 + $0x28] sm:$0xff]  ;;  %v330_v7 = vld [vmem:[%s481_s3 + $0x20] sm:$0xff]  ;;  %v329_v9 = vld [vmem:[%s481_s3 + $0x18] sm:$0xff] }
   0x6   :  { %74 = vmatpush.bf16.msra.mxu0 %v324_v2  ;;  %v28_v8 = vld [vmem:[%s478_s0] sm:$0xf]  ;;  %v328_v10 = vld [vmem:[%s481_s3 + $0x10] sm:$0xff]  ;;  %v327_v11 = vld [vmem:[%s481_s3 + $0x8] sm:$0xff] }
   0x7   :  { %153 = vmatpush.bf16.msra.mxu1 %v332_v3  ;;  %v326_v12 = vld [vmem:[%s481_s3] sm:$0xff]  ;;  %v337_v13 = vld [vmem:[%s483_s5 + $0x18] sm:$0xff]  ;;  %v336_v14 = vld [vmem:[%s483_s5 + $0x10] sm:$0xff] }
   0x8   :  { %210 = vmatpush.bf16.msra.mxu2 %v337_v13  ;;  %v339_v15 = vld [vmem:[%s480_s2] ss:$0 sm:$0xff]  ;;  %v335_v21 = vld [vmem:[%s483_s5 + $0x8] sm:$0xff] }
   0x9   :  { %v334_v22 = vld [vmem:[%s483_s5] sm:$0xff] }
   0xa   :  { %75 = vmatpush.bf16.msra.mxu0 %v323_v4  ;;  %v340_v23 = vld [vmem:[%s482_s4] ss:$0 sm:$0xff]  ;;  %s372_s4 = smov [#allocation2]  }
   0xb   :  { %154 = vmatpush.bf16.msra.mxu1 %v331_v5  ;;  %v341_v29 = vld [vmem:[%s484_s6] ss:$0 sm:$0xff]  ;;  %s244_s5 = sshll.u32 %s372_s4, 4  ;;  %s246_s6 = sshll.u32 %s485_s7, 4  ;;  %s245_s5 = int_to_ptr.vmem [resolvable:$true] %s244_s5  ;;  %s247_s6 = int_to_ptr.hbm [resolvable:$true] %s246_s6 }
   0xc   :  { %211 = vmatpush.bf16.msra.mxu2 %v336_v14 }
   0xe   :  { %76 = vmatpush.bf16.msra.mxu0 %v322_v6 }
   0xf   :  { %155 = vmatpush.bf16.msra.mxu1 %v330_v7 }
  0x10   :  { %212 = vmatpush.bf16.msra.mxu2 %v335_v21 }
  0x11   :  { %271 = vmatmul.msk.bf16.vlgmr.msra.gmra.mxu0 %vm65_vm0, %v28_v8 }
  0x13   :  { %156 = vmatpush.bf16.msra.mxu1 %v329_v9 }
  0x14   :  { %213 = vmatpush.bf16.msra.mxu2 %v334_v22 }
  0x17   :  { %157 = vmatpush.bf16.msra.mxu1 %v328_v10 }
  0x1b   :  { %158 = vmatpush.bf16.msra.mxu1 %v327_v11 }
  0x1f   :  { %159 = vmatpush.bf16.msra.mxu1 %v326_v12 }
  0x8e   :  { %v78_v16 = vpop.f32.mrf.mxu0 }
  0x8f   :  { %v79_v17 = vadd.f32 %v339_v15, %v78_v16 }
  0x91   :  { %v82_v18 = vmax.f32 %v79_v17, 0.0 }
  0x93   :  { %v83_v19 = vpack.c.bf16 %v82_v18, %v82_v18 }
  0x95   :  { %160 = vmatmul.bf16.vlgmr.msra.gmra.mxu1 %v83_v19 }
  0x96   :  { %v80_v20 = vpop.f32.mrf.mxu0 }
 0x112   :  { %v161_v24 = vpop.f32.mrf.mxu1 }
 0x113   :  { %v162_v25 = vadd.f32 %v340_v23, %v161_v24 }
 0x115   :  { %v165_v26 = vmax.f32 %v162_v25, 0.0 }
 0x117   :  { %v166_v27 = vpack.c.bf16 %v165_v26, %v165_v26 }
 0x119   :  { %320 = vmatmul.msk.bf16.vlgmr.msra.gmra.mxu2 %vm65_vm0, %v166_v27 }
 0x11a   :  { %v163_v28 = vpop.f32.mrf.mxu1 }
 0x19c   :  { %v215_v30 = vpop.f32.mrf.mxu2 }
 0x19d   :  { %v216_v31 = vadd.f32 %v341_v29, %v215_v30 }
 0x19f   :  { %v321_v32 = vmul.f32 -1.442695, %v216_v31 }
 0x1a1   :  { %342 = vpow2.f32 %v321_v32 }
 0x1a4   :  { %v217_v33 = vpop.f32.mrf.mxu2 }
 0x1a7   :  { %v343_v34 = vpop.eup %342 }
 0x1a8   :  { %v222_v35 = vadd.f32 1.0, %v343_v34 }
 0x1aa   :  { %344 = vrcp.f32 %v222_v35  ;;  %v234_v39 = vand.u32 2147483648, %v222_v35  ;;  %v232_v41 = vand.u32 2147483647, %v222_v35  ;;  %vm228_vm2 = vweird.f32 %v222_v35 }
 0x1ac   :  { %v235_v43 = vor.u32 1.1754944e-38, %v234_v39  ;;  %vm233_vm4 = vcmp.eq.f32.partialorder %v232_v41, 8.507059e+37 }
 0x1b0   :  { %v345_v36 = vpop.eup %344 }
 0x1b1   :  { %v224_v37 = vmul.f32 %v345_v36, %v222_v35  ;;  %vm229_vm1 = vweird.f32 %v345_v36 }
 0x1b2   :  { %vm230_vm3 = vmor %vm228_vm2, %vm229_vm1 }
 0x1b3   :  { %v225_v38 = vsub.f32 1.0, %v224_v37 }
 0x1b5   :  { %v226_v40 = vmul.f32 %v345_v36, %v225_v38 }
 0x1b7   :  { %v227_v42 = vadd.f32 %v345_v36, %v226_v40 }
 0x1b9   :  { %v231_v44 = vsel %vm230_vm3, %v345_v36, %v227_v42 }
 0x1ba   :  { %v236_v45 = vsel %vm233_vm4, %v235_v43, %v231_v44 }
 0x1bb   :  { %238 = vst [vmem:[#allocation2] sm:$0xff] %v236_v45 }
 0x1bc   :  { %249 = dma.vmem_to_hbm [thread:$0]  %s245_s5, 128, %s247_s6, [#allocation3]  }
 0x1bd   :  { %370 = dma.done.wait [#allocation3], 128  }
 0x1be   :  { %371 = vsyncadd [#allocation3], 4294967168 }
 0x1bf   :  { %254 = vsyncpa [#allocation3], 1 }

</bundles_post_ra>
